<compile_context>
chip_gen: v7x
topology: tpu7x:2x2x1
jax: 0.10.0
libtpu: 0.0.40
codegen_flags: <defaults>
</compile_context>

<pallas_src>
import jax
import jax.numpy as jnp
from jax import lax
from jax.experimental import pallas as pl
from jax.experimental.pallas import tpu as pltpu

IN_DIM = 794
HID_DIM = 128
OUT_DIM = 2


def _round_up(n, m):
    return ((n + m - 1) // m) * m


def benmodel_kernel(x_ref, w1_ref, b1_ref, w2pm_ref, b2pm_ref, o_ref):
    # x:    (tile_b, 794) f32 (or bf16)     w1:   (794, 128) bf16 (or f32)
    # b1:   (1, 128) f32                    w2pm: (8, 128) f32  row0=+(w2[:,0]-w2[:,1]),
    #                                              row1=-(row0), rows 2..7 = 0
    # b2pm: (8, 1) f32  (row0=+(b2_0-b2_1), row1=-(...))
    # o:    (2, tile_b) f32  row0 = softmax[...,0], row1 = softmax[...,1]
    x = x_ref[...]
    w1 = w1_ref[...]
    if x.dtype != w1.dtype:
        x = x.astype(w1.dtype)          # in-VMEM cast: MXU eats bf16, accumulates f32

    # fc1 + relu (MXU, f32 accumulate).
    h = jnp.dot(x, w1, preferred_element_type=jnp.float32)        # (tile_b, 128)
    h = jnp.maximum(h + b1_ref[...], 0.0)

    # fc2 + 2-class softmax, lane-dense along batch:
    #   dT = w2pm @ h^T  -> (8, tile_b); row0 = l0-l1, row1 = l1-l0 (rows 2..7 unused)
    #   softmax([l0, l1]) = [sigmoid(l0-l1), sigmoid(l1-l0)]
    dT = lax.dot_general(w2pm_ref[...], h,
                         dimension_numbers=(((1,), (1,)), ((), ())),
                         preferred_element_type=jnp.float32)
    dT = dT + b2pm_ref[...]
    pT = 1.0 / (1.0 + jnp.exp(-dT))                               # exact (no approx rcp)
    o_ref[...] = pT[0:2, :].astype(o_ref.dtype)


def benmodel_forward(x, w1, b1, w2, b2, *, tile_b=2048, use_bf16=True):
    """x:(B,794); w1:(794,128); b1:(1,128)/(128,); w2:(128,2); b2:(1,2)/(2,) -> (B,2)."""
    B = x.shape[0]
    assert x.shape[1] == IN_DIM

    # Tile selection: single full block for small B (block dims == array dims is
    # always legal); otherwise a multiple of 128 so the (2, tile_b) output block
    # stays lane-aligned.  No batch padding; a partial tail tile is masked by
    # Pallas and its rows are independent (sliced off below).
    tile_b = _round_up(max(1, min(tile_b, B)), 128)
    if tile_b >= B:
        tile_b = B
    n_tiles = pl.cdiv(B, tile_b)
    b_pad = n_tiles * tile_b

    w1_k = w1.astype(jnp.bfloat16 if use_bf16 else jnp.float32)
    b1f = b1.reshape(1, HID_DIM).astype(jnp.float32)

    # Fold fc2 + softmax into +/- logit-difference rows (padded to 8 sublanes).
    w2f = w2.astype(jnp.float32)
    b2f = b2.reshape(-1).astype(jnp.float32)
    w2d = w2f[:, 0] - w2f[:, 1]                                   # (128,)
    b2d = b2f[0] - b2f[1]
    w2pm = jnp.zeros((8, HID_DIM), jnp.float32).at[0].set(w2d).at[1].set(-w2d)
    b2pm = jnp.zeros((8, 1), jnp.float32).at[0, 0].set(b2d).at[1, 0].set(-b2d)

    bytes_accessed = int(x.size * x.dtype.itemsize
                         + w1_k.size * w1_k.dtype.itemsize
                         + (b1f.size + w2pm.size + b2pm.size + OUT_DIM * b_pad) * 4)

    out_t = pl.pallas_call(
        benmodel_kernel,
        out_shape=jax.ShapeDtypeStruct((OUT_DIM, b_pad), jnp.float32),
        grid=(n_tiles,),
        in_specs=[
            pl.BlockSpec((tile_b, IN_DIM), lambda i: (i, 0)),     # x: streamed per tile
            pl.BlockSpec((IN_DIM, HID_DIM), lambda i: (0, 0)),    # VMEM-resident weights
            pl.BlockSpec((1, HID_DIM), lambda i: (0, 0)),
            pl.BlockSpec((8, HID_DIM), lambda i: (0, 0)),
            pl.BlockSpec((8, 1), lambda i: (0, 0)),
        ],
        out_specs=pl.BlockSpec((OUT_DIM, tile_b), lambda i: (0, i)),
        compiler_params=pltpu.CompilerParams(
            dimension_semantics=("parallel",),        # v7x: split batch tiles over 2 TCs
            vmem_limit_bytes=40 * 1024 * 1024,        # fits 2x f32 x-tile on v5e/v7x
        ),
        cost_estimate=pl.CostEstimate(
            flops=2 * b_pad * HID_DIM * (IN_DIM + 8),
            transcendentals=8 * b_pad,
            bytes_accessed=bytes_accessed,
        ),
    )(x, w1_k, b1f, w2pm, b2pm)

    return out_t[:, :B].T                                          # (B, 2)


def reference_forward(x, w1, b1, w2, b2):
    hp = jax.lax.Precision.HIGHEST
    h = jnp.maximum(jnp.dot(x, w1, precision=hp) + b1.reshape(1, -1), 0.0)
    logits = jnp.dot(h, w2, precision=hp) + b2.reshape(1, -1)
    return jax.nn.softmax(logits, axis=1)


if __name__ == "__main__":
    key = jax.random.PRNGKey(0)
    kx, k1, k2, k3, k4 = jax.random.split(key, 5)

    B = 8
    x = jax.random.normal(kx, (B, IN_DIM), dtype=jnp.float32)

    # Params stored pre-transposed to (in, out), biases as (1, out) — matches
    # nn.Linear(794,128) / nn.Linear(128,2) semantics (y = x @ W^T + b).
    w1 = jax.random.normal(k1, (IN_DIM, HID_DIM), dtype=jnp.float32) * 0.02
    b1 = jax.random.normal(k2, (1, HID_DIM), dtype=jnp.float32) * 0.02
    w2 = jax.random.normal(k3, (HID_DIM, OUT_DIM), dtype=jnp.float32) * 0.02
    b2 = jax.random.normal(k4, (1, OUT_DIM), dtype=jnp.float32) * 0.02

    out = benmodel_forward(x, w1, b1, w2, b2)
    out = jax.block_until_ready(out)

    # Reference #1: same bf16-rounded x/w1 the kernel feeds the MXU, exact f32 math.
    ref_bf16_in = reference_forward(
        x.astype(jnp.bfloat16).astype(jnp.float32),
        w1.astype(jnp.bfloat16).astype(jnp.float32), b1, w2, b2)
    # Reference #2: pure f32 forward (looser bound: the kernel rounds x/w1 to bf16).
    ref_f32 = reference_forward(x, w1, b1, w2, b2)

    assert out.shape == (B, OUT_DIM), out.shape
    assert bool(jnp.all(jnp.isfinite(out)))
    err1 = float(jnp.max(jnp.abs(out - ref_bf16_in)))
    err2 = float(jnp.max(jnp.abs(out - ref_f32)))
    assert err1 < 2e-3, f"mismatch vs bf16-input reference: {err1}"
    assert err2 < 5e-3, f"mismatch vs f32 reference: {err2}"
    assert jnp.allclose(jnp.sum(out, axis=1), jnp.ones((B,)), atol=1e-5)

    print("KERNEL_OK")
</pallas_src>

<mosaic_0001>
module attributes {stable_mosaic.version = 11 : i64} {
  func.func @benmodel_kernel(%arg0: i32, %arg1: memref<8x794xf32, #tpu.memory_space<vmem>>, %arg2: memref<794x128xbf16, #tpu.memory_space<vmem>>, %arg3: memref<1x128xf32, #tpu.memory_space<vmem>>, %arg4: memref<8x128xf32, #tpu.memory_space<vmem>>, %arg5: memref<8x1xf32, #tpu.memory_space<vmem>>, %arg6: memref<2x8xf32, #tpu.memory_space<vmem>>) attributes {dimension_semantics = [#tpu.dimension_semantics<parallel>], iteration_bounds = array<i64: 1>, scalar_prefetch = 0 : i64, scratch_operands = 0 : i64, tpu.core_type = #tpu.core_type<tc>, window_params = [{transform_indices = @transform_0, window_bounds = array<i64: 8, 794>}, {pipeline_mode = #tpu.pipeline_mode<synchronous>, transform_indices = @transform_1, window_bounds = array<i64: 794, 128>}, {pipeline_mode = #tpu.pipeline_mode<synchronous>, transform_indices = @transform_2, window_bounds = array<i64: 1, 128>}, {pipeline_mode = #tpu.pipeline_mode<synchronous>, transform_indices = @transform_3, window_bounds = array<i64: 8, 128>}, {pipeline_mode = #tpu.pipeline_mode<synchronous>, transform_indices = @transform_4, window_bounds = array<i64: 8, 1>}, {transform_indices = @transform_5, window_bounds = array<i64: 2, 8>}]} {
    %c0 = arith.constant 0 : index
    %c0_0 = arith.constant 0 : index
    %0 = vector.load %arg1[%c0, %c0_0] : memref<8x794xf32, #tpu.memory_space<vmem>>, vector<8x794xf32>
    %c0_1 = arith.constant 0 : index
    %c0_2 = arith.constant 0 : index
    %1 = vector.load %arg2[%c0_1, %c0_2] : memref<794x128xbf16, #tpu.memory_space<vmem>>, vector<794x128xbf16>
    %2 = arith.truncf %0 : vector<8x794xf32> to vector<8x794xbf16>
    %cst = arith.constant dense<0.000000e+00> : vector<8x128xf32>
    %3 = tpu.matmul %2, %1, %cst {dimension_numbers = #tpu.dot_dimension_numbers<[1], [0], [0], [1], [0, 0, 1, 1], [], []>} : vector<8x794xbf16>, vector<794x128xbf16>, vector<8x128xf32> -> vector<8x128xf32>
    %c0_3 = arith.constant 0 : index
    %c0_4 = arith.constant 0 : index
    %4 = vector.load %arg3[%c0_3, %c0_4] : memref<1x128xf32, #tpu.memory_space<vmem>>, vector<1x128xf32>
    %5 = vector.broadcast %4 : vector<1x128xf32> to vector<8x128xf32>
    %6 = arith.addf %3, %5 : vector<8x128xf32>
    %cst_5 = arith.constant 0.000000e+00 : f32
    %7 = vector.broadcast %cst_5 : f32 to vector<8x128xf32>
    %8 = arith.maximumf %6, %7 : vector<8x128xf32>
    %c0_6 = arith.constant 0 : index
    %c0_7 = arith.constant 0 : index
    %9 = vector.load %arg4[%c0_6, %c0_7] : memref<8x128xf32, #tpu.memory_space<vmem>>, vector<8x128xf32>
    %cst_8 = arith.constant dense<0.000000e+00> : vector<8x8xf32>
    %10 = tpu.matmul %9, %8, %cst_8 {dimension_numbers = #tpu.dot_dimension_numbers<[1], [1], [0], [0], [0, 0, 1, 0], [], []>} : vector<8x128xf32>, vector<8x128xf32>, vector<8x8xf32> -> vector<8x8xf32>
    %c0_9 = arith.constant 0 : index
    %c0_10 = arith.constant 0 : index
    %11 = vector.load %arg5[%c0_9, %c0_10] : memref<8x1xf32, #tpu.memory_space<vmem>>, vector<8x1xf32>
    %12 = vector.broadcast %11 : vector<8x1xf32> to vector<8x8xf32>
    %13 = arith.addf %10, %12 : vector<8x8xf32>
    %cst_11 = arith.constant 0.000000e+00 : f32
    %14 = vector.broadcast %cst_11 : f32 to vector<8x8xf32>
    %15 = arith.subf %14, %13 : vector<8x8xf32>
    %16 = math.exp %15 : vector<8x8xf32>
    %cst_12 = arith.constant 1.000000e+00 : f32
    %17 = vector.broadcast %cst_12 : f32 to vector<8x8xf32>
    %18 = arith.addf %17, %16 : vector<8x8xf32>
    %cst_13 = arith.constant 1.000000e+00 : f32
    %19 = vector.broadcast %cst_13 : f32 to vector<8x8xf32>
    %20 = arith.divf %19, %18 : vector<8x8xf32>
    %21 = vector.extract_strided_slice %20 {offsets = [0, 0], sizes = [2, 8], strides = [1, 1]} : vector<8x8xf32> to vector<2x8xf32>
    %c0_14 = arith.constant 0 : index
    %c0_15 = arith.constant 0 : index
    %22 = vector.load %arg6[%c0_14, %c0_15] : memref<2x8xf32, #tpu.memory_space<vmem>>, vector<2x8xf32>
    tpu.vector_store %arg6[%c0_14, %c0_15], %21 {strides = array<i32>} : memref<2x8xf32, #tpu.memory_space<vmem>>, vector<2x8xf32>,
    return
  }
  func.func @transform_0(%arg0: i32) -> (i32, i32) {
    %c0_i32 = arith.constant 0 : i32
    %c0_i32_0 = arith.constant 0 : i32
    return %arg0, %c0_i32 : i32, i32
  }
  func.func @transform_1(%arg0: i32) -> (i32, i32) {
    %c0_i32 = arith.constant 0 : i32
    %c0_i32_0 = arith.constant 0 : i32
    %c0_i32_1 = arith.constant 0 : i32
    return %c0_i32, %c0_i32_0 : i32, i32
  }
  func.func @transform_2(%arg0: i32) -> (i32, i32) {
    %c0_i32 = arith.constant 0 : i32
    %c0_i32_0 = arith.constant 0 : i32
    %c0_i32_1 = arith.constant 0 : i32
    return %c0_i32, %c0_i32_0 : i32, i32
  }
  func.func @transform_3(%arg0: i32) -> (i32, i32) {
    %c0_i32 = arith.constant 0 : i32
    %c0_i32_0 = arith.constant 0 : i32
    %c0_i32_1 = arith.constant 0 : i32
    return %c0_i32, %c0_i32_0 : i32, i32
  }
  func.func @transform_4(%arg0: i32) -> (i32, i32) {
    %c0_i32 = arith.constant 0 : i32
    %c0_i32_0 = arith.constant 0 : i32
    %c0_i32_1 = arith.constant 0 : i32
    return %c0_i32, %c0_i32_0 : i32, i32
  }
  func.func @transform_5(%arg0: i32) -> (i32, i32) {
    %c0_i32 = arith.constant 0 : i32
    %c0_i32_0 = arith.constant 0 : i32
    return %c0_i32, %arg0 : i32, i32
  }
}

</mosaic_0001>

<bundles_post_ra>
// kernel: tpu_custom_call.1
= control target key start
LH: loop header
LB: loop body
LE: loop exit
PB: predicated region body
PF: predicated region fallthrough
CT: control target
= control target key end

     0   :  { %10 = vsyncpa [#allocation3], 0  ;;  %s1101_s0 = inlined_call_operand.hbm [shape: f32[8,794], index: 0, kind: input, shape index: {}]   ;;  %s1102_s1 = inlined_call_operand.hbm [shape: bf16[794,128], index: 1, kind: input, shape index: {}]   ;;  %s1103_s2 = inlined_call_operand.vmem [shape: f32[1,128], index: 2, kind: input, shape index: {}]   ;;  %s1104_s3 = inlined_call_operand.vmem [shape: f32[8,128], index: 3, kind: input, shape index: {}]   ;;  %s1105_s4 = inlined_call_operand.vmem [shape: f32[8,1], index: 4, kind: input, shape index: {}]   ;;  %s1106_s5 = inlined_call_operand.hbm [shape: f32[2,8], index: 5, kind: output, shape index: {}]  }
   0x1   :  { %11 = vsyncpa [#allocation6], 0 }
   0x2   :  { %12 = vsyncpa [#allocation4], 0  ;;  %s1009_s18 = smov [#allocation2]   ;;  %s1010_s20 = smov [#allocation5]  }
   0x3   :  { %s19_s19 = sshll.u32 %s1009_s18, 4  ;;  %s28_s21 = sshll.u32 %s1010_s20, 4  ;;  %s20_s19 = int_to_ptr.vmem [resolvable:$true] %s19_s19  ;;  %s1047_s21 = int_to_ptr.vmem [resolvable:$true] %s28_s21 }
   0x4   :  { %s937_s24 = scalar_lea.hbm %s1101_s0, 896 }
   0x5   :  { %p938_p0 = scmp.ne.s32.totalorder %s1101_s0, %s937_s24  ;;  %p941_p1 = scmp.lt.u32.totalorder %s937_s24, %s1101_s0 }
   0x7   :  { %p943_p2 = pnand %p941_p1, %p938_p0 }
   0x9   :  { %946 = shalt.err (!%p943_p2)
}
   0xa   :  { %s947_s29 = scalar_lea.vmem %s20_s19, 896  ;;  %p952_p4 = scmp.lt.s32.totalorder %s20_s19, %s20_s19 }
   0xb   :  { %p948_p3 = scmp.ne.s32.totalorder %s20_s19, %s947_s29  ;;  %p953_p5 = scmp.lt.s32.totalorder %s947_s29, %s947_s29 }
   0xd   :  { %p954_p6 = por %p953_p5, %p952_p4 }
   0xf   :  { %p955_p7 = pnand %p954_p6, %p948_p3 }
  0x11   :  { %958 = shalt.err (!%p955_p7)
}
  0x12   :  { %22 = dma.hbm_to_vmem [thread:$0]  %s1101_s0, 896, %s20_s19, [#allocation3]  }
  0x13   :  { %s959_s9 = scalar_lea.hbm %s1102_s1, 6400 }
  0x14   :  { %p960_p8 = scmp.ne.s32.totalorder %s1102_s1, %s959_s9  ;;  %p963_p9 = scmp.lt.u32.totalorder %s959_s9, %s1102_s1 }
  0x16   :  { %p965_p10 = pnand %p963_p9, %p960_p8 }
  0x18   :  { %968 = shalt.err (!%p965_p10)
}
  0x19   :  { %s969_s14 = scalar_lea.vmem %s1047_s21, 6400  ;;  %p974_p12 = scmp.lt.s32.totalorder %s1047_s21, %s1047_s21 }
  0x1a   :  { %p970_p11 = scmp.ne.s32.totalorder %s1047_s21, %s969_s14  ;;  %p975_p13 = scmp.lt.s32.totalorder %s969_s14, %s969_s14 }
  0x1c   :  { %p976_p0 = por %p975_p13, %p974_p12 }
  0x1e   :  { %p977_p1 = pnand %p976_p0, %p970_p11 }
  0x20   :  { %980 = shalt.err (!%p977_p1)
}
  0x21   :  { %s1011_s0 = smov 64   ;;  %s1012_s15 = smov 4  }
  0x22   :  { %34 = dma.hbm_to_vmem [thread:$0]  %s1102_s1, 6400, %s1047_s21, [#allocation6], %s1011_s0, %s1011_s0, %s1012_s15  }
  0x23   :  { %1003 = dma.done.wait [#allocation3], 896  }
  0x24   :  { %1004 = vsyncadd [#allocation3], 4294966400 }
  0x25   :  { %1005 = dma.done.wait [#allocation6], 6400  }
  0x26   :  { %1006 = vsyncadd [#allocation6], 4294960896  ;;  %v883_v0 = vld [vmem:[#allocation5 + $0x40] sm:$0xff]   ;;  %v887_v4 = vld [vmem:[#allocation5 + $0x48] sm:$0xff]   ;;  %v1013_v44 = vmov 0.0   ;;  %vm1014_vm0 = vmmov 0  }
  0x27   :  { %v884_v1 = vld [vmem:[#allocation5] sm:$0xff]   ;;  %790 = vmatprep.subr.bf16.mxu0 %v883_v0  ;;  %v888_v5 = vld [vmem:[#allocation5 + $0x8] sm:$0xff]   ;;  %v891_v8 = vld [vmem:[#allocation5 + $0x50] sm:$0xff]   ;;  %vm472_vm1 = vcmask 1044480   ;;  %vm468_vm2 = vcmask 211968   ;;  %s1016_s21 = smov [#allocation7]  }
  0x28   :  { %v885_v2 = vld [vmem:[#allocation5 + $0xc0] sm:$0xff]   ;;  %791 = vmatpush3.bf16.msra.mxu0 %v884_v1  ;;  %v889_v6 = vld [vmem:[#allocation5 + $0xc8] sm:$0xff]   ;;  %v892_v9 = vld [vmem:[#allocation5 + $0x10] sm:$0xff]   ;;  %s728_s22 = sshll.u32 %s1016_s21, 4  ;;  %vm720_vm3 = vcmask 58368   ;;  %s729_s22 = int_to_ptr.vmem [resolvable:$true] %s728_s22 }
  0x29   :  { %v886_v3 = vld [vmem:[#allocation5 + $0x80] sm:$0xff]   ;;  %812 = vmatprep.subr.bf16.mxu1 %v885_v2  ;;  %792 = vmatprep.subr.bf16.mxu0 %v887_v4  ;;  %v890_v7 = vld [vmem:[#allocation5 + $0x88] sm:$0xff]   ;;  %v893_v10 = vld [vmem:[#allocation5 + $0xd0] sm:$0xff]   ;;  %s981_s23 = scalar_lea.vmem %s729_s22, 32  ;;  %p986_p3 = scmp.lt.s32.totalorder %s729_s22, %s729_s22 }
  0x2a   :  { %813 = vmatpush3.bf16.msra.mxu1 %v886_v3  ;;  %v894_v11 = vld [vmem:[#allocation5 + $0x90] sm:$0xff]   ;;  %v895_v12 = vld [vmem:[#allocation5 + $0x58] sm:$0xff]   ;;  %v899_v16 = vld [vmem:[#allocation5 + $0x60] sm:$0xff]   ;;  %v1015_v3 = vmov 0   ;;  %p982_p2 = scmp.ne.s32.totalorder %s729_s22, %s981_s23  ;;  %p987_p4 = scmp.lt.s32.totalorder %s981_s23, %s981_s23 }
  0x2b   :  { %814 = vmatprep.subr.bf16.mxu1 %v889_v6  ;;  %v896_v13 = vld [vmem:[#allocation5 + $0x18] sm:$0xff]   ;;  %v900_v17 = vld [vmem:[#allocation5 + $0x20] sm:$0xff]   ;;  %v903_v20 = vld [vmem:[#allocation5 + $0x68] sm:$0xff]   ;;  %882 = vset.pattern.permute.xlu0 %v1015_v3 }
  0x2c   :  { %793 = vmatpush3.bf16.msra.mxu0 %v888_v5  ;;  %v897_v14 = vld [vmem:[#allocation5 + $0xd8] sm:$0xff]   ;;  %v901_v18 = vld [vmem:[#allocation5 + $0xe0] sm:$0xff]   ;;  %v904_v21 = vld [vmem:[#allocation5 + $0x28] sm:$0xff]   ;;  %p988_p5 = por %p987_p4, %p986_p3 }
  0x2d   :  { %794 = vmatprep.subr.bf16.mxu0 %v891_v8  ;;  %v898_v15 = vld [vmem:[#allocation5 + $0x98] sm:$0xff]   ;;  %v902_v19 = vld [vmem:[#allocation5 + $0xa0] sm:$0xff]   ;;  %v905_v22 = vld [vmem:[#allocation5 + $0xe8] sm:$0xff]  }
  0x2e   :  { %815 = vmatpush3.bf16.msra.mxu1 %v890_v7  ;;  %v906_v23 = vld [vmem:[#allocation5 + $0xa8] sm:$0xff]   ;;  %v907_v24 = vld [vmem:[#allocation5 + $0x70] sm:$0xff]   ;;  %v911_v28 = vld [vmem:[#allocation5 + $0x78] sm:$0xff]   ;;  %p989_p6 = pnand %p988_p5, %p982_p2 }
  0x2f   :  { %816 = vmatprep.subr.bf16.mxu1 %v893_v10  ;;  %v908_v25 = vld [vmem:[#allocation5 + $0x30] sm:$0xff]   ;;  %v912_v29 = vld [vmem:[#allocation5 + $0x38] sm:$0xff]   ;;  %v48_v34 = vld [vmem:[#allocation2] sm:$0xff] }
  0x30   :  { %795 = vmatpush3.bf16.msra.mxu0 %v892_v9  ;;  %v909_v26 = vld [vmem:[#allocation5 + $0xf0] sm:$0xff]   ;;  %v913_v30 = vld [vmem:[#allocation5 + $0xf8] sm:$0xff]   ;;  %v155_v35 = vpack.c.bf16 %v48_v34, %v48_v34  ;;  %v915_v36 = vld [vmem:[#allocation5 + $0x140] sm:$0xff]  }
  0x31   :  { %796 = vmatprep.subr.bf16.mxu0 %v895_v12  ;;  %v910_v27 = vld [vmem:[#allocation5 + $0xb0] sm:$0xff]   ;;  %v914_v33 = vld [vmem:[#allocation5 + $0xb8] sm:$0xff]   ;;  %v51_v37 = vld [vmem:[#allocation2 + $0x18] sm:$0xff] }
  0x32   :  { %817 = vmatpush3.bf16.msra.mxu1 %v894_v11  ;;  %v49_v31 = vld [vmem:[#allocation2 + $0x8] sm:$0xff]  ;;  %v158_v38 = vpack.c.bf16 %v51_v37, %v51_v37  ;;  %v916_v39 = vld [vmem:[#allocation5 + $0x100] sm:$0xff]   ;;  %v50_v40 = vld [vmem:[#allocation2 + $0x10] sm:$0xff] }
  0x33   :  { %818 = vmatprep.subr.bf16.mxu1 %v897_v14  ;;  %v156_v32 = vpack.c.bf16 %v49_v31, %v49_v31  ;;  %v157_v41 = vpack.c.bf16 %v50_v40, %v50_v40  ;;  %v917_v42 = vld [vmem:[#allocation5 + $0x148] sm:$0xff]   ;;  %v919_v45 = vld [vmem:[#allocation5 + $0x150] sm:$0xff]   ;;  %v921_v47 = vld [vmem:[#allocation5 + $0x158] sm:$0xff]  }
  0x34   :  { %797 = vmatpush3.bf16.msra.mxu0 %v896_v13  ;;  %548 = vmatprep.mubr.bf16.mxu1 %v158_v38  ;;  %v918_v43 = vld [vmem:[#allocation5 + $0x108] sm:$0xff]   ;;  %v920_v46 = vld [vmem:[#allocation5 + $0x110] sm:$0xff]   ;;  %v922_v48 = vld [vmem:[#allocation5 + $0x118] sm:$0xff]  }
  0x35   :  { %798 = vmatprep.subr.bf16.mxu0 %v899_v16  ;;  %508 = vmatprep.mubr.bf16.mxu0 %v156_v32  ;;  %v923_v49 = vld [vmem:[#allocation5 + $0x160] sm:$0xff]   ;;  %v925_v52 = vld [vmem:[#allocation5 + $0x168] sm:$0xff]   ;;  %v53_v53 = vld [vmem:[#allocation2 + $0x28] sm:$0xff] }
  0x36   :  { %819 = vmatpush3.bf16.msra.mxu1 %v898_v15  ;;  %v924_v50 = vld [vmem:[#allocation5 + $0x120] sm:$0xff]   ;;  %v160_v54 = vpack.c.bf16 %v53_v53, %v53_v53  ;;  %v932_v55 = vld [vmem:[#allocation5 + $0x188] sm:$0x1f]   ;;  %v54_v57 = vld [vmem:[#allocation2 + $0x30] sm:$0xff] }
  0x37   :  { %820 = vmatprep.subr.bf16.mxu1 %v901_v18  ;;  %v929_v51 = vld [vmem:[#allocation5 + $0x180] sm:$0xff]   ;;  %v926_v56 = vld [vmem:[#allocation5 + $0x128] sm:$0xff]   ;;  %v927_v58 = vld [vmem:[#allocation5 + $0x170] sm:$0xff]   ;;  %v474_v59 = vsel %vm472_vm1, %v932_v55, 0  ;;  %v161_v60 = vpack.c.bf16 %v54_v57, %v54_v57 }
  0x38   :  { %799 = vmatpush3.bf16.msra.mxu0 %v900_v17  ;;  %v928_v61 = vld [vmem:[#allocation5 + $0x130] sm:$0xff]   ;;  %v930_v62 = vld [vmem:[#allocation5 + $0x178] sm:$0xff]   ;;  %v52_v0 = vld [vmem:[#allocation2 + $0x20] sm:$0xff] }
  0x39   :  { %800 = vmatprep.subr.bf16.mxu0 %v903_v20  ;;  %v931_v63 = vld [vmem:[#allocation5 + $0x138] sm:$0xff]   ;;  %v159_v1 = vpack.c.bf16 %v52_v0, %v52_v0  ;;  %v638_v2 = vld [vmem:[%s1105_s4] sm:$0xff] }
  0x3a   :  { %821 = vmatpush3.bf16.msra.mxu1 %v902_v19  ;;  %641 = vperm.xlu0 %882, %v638_v2   ;;  %v738_v5 = vld [vmem:[%s1103_s2] ss:$0 sm:$0xff] }
  0x3b   :  { %822 = vmatprep.subr.bf16.mxu1 %v905_v22 }
  0x3c   :  { %801 = vmatpush3.bf16.msra.mxu0 %v904_v21 }
  0x3d   :  { %802 = vmatprep.subr.bf16.mxu0 %v907_v24 }
  0x3e   :  { %823 = vmatpush3.bf16.msra.mxu1 %v906_v23 }
  0x3f   :  { %824 = vmatprep.subr.bf16.mxu1 %v909_v26 }
  0x40   :  { %803 = vmatpush3.bf16.msra.mxu0 %v908_v25 }
  0x41   :  { %804 = vmatprep.subr.bf16.mxu0 %v911_v28 }
  0x42   :  { %825 = vmatpush3.bf16.msra.mxu1 %v910_v27 }
  0x43   :  { %826 = vmatprep.subr.bf16.mxu1 %v913_v30 }
  0x44   :  { %805 = vmatpush3.bf16.msra.mxu0 %v912_v29  ;;  %v637_v29 = vld [vmem:[%s1104_s3] sm:$0xff] }
  0x45   :  { %834 = vmatprep.subr.bf16.mxu0 %v915_v36 }
  0x46   :  { %827 = vmatpush3.bf16.msra.mxu1 %v914_v33 }
  0x47   :  { %509 = vmatmul.mubr.bf16.vlgmr.msra.gmra.mrb[0].mxu0 %v155_v35  ;;  %861 = vmatprep.subr.bf16.mxu1 %v1013_v44 }
  0x48   :  { %835 = vmatpush3.bf16.msra.mxu0 %v916_v39  ;;  %588 = vmatprep.mubr.bf16.mxu0 %v160_v54 }
  0x49   :  { %549 = vmatmul.mubr.bf16.vlgmr.msra.gmra.mrb[0].mxu1 %v157_v41  ;;  %836 = vmatprep.subr.bf16.mxu0 %v917_v42 }
  0x4a   :  { %865 = vmatprep.mubr.msk.bf16.mxu1 %vm1014_vm0, %v1013_v44  ;;  %862 = vmatpush3.bf16.msra.mxu1 %v929_v51 }
  0x4b   :  { %863 = vmatprep.subr.bf16.mxu1 %v1013_v44 }
  0x4c   :  { %837 = vmatpush3.bf16.msra.mxu0 %v918_v43 }
  0x4d   :  { %838 = vmatprep.subr.bf16.mxu0 %v919_v45 }
  0x4e   :  { %864 = vmatpush3.bf16.msra.mxu1 %v474_v59 }
  0x4f   :  { %869 = vmatprep.subr.mxu1 %v1013_v44 }
  0x50   :  { %839 = vmatpush3.bf16.msra.mxu0 %v920_v46 }
  0x51   :  { %840 = vmatprep.subr.bf16.mxu0 %v921_v47  ;;  %866 = vmatmul.mubr.msk.bf16.vlgmr.msra.gmra.mrb[4].mxu1 %vm468_vm2, %v161_v60 }
  0x52   :  { %871 = vmatprep.mubr.msk.f32.mxu1 %vm1014_vm0, %v1013_v44 }
  0x54   :  { %841 = vmatpush3.bf16.msra.mxu0 %v922_v48 }
  0x55   :  { %842 = vmatprep.subr.bf16.mxu0 %v923_v49 }
  0x58   :  { %843 = vmatpush3.bf16.msra.mxu0 %v924_v50 }
  0x59   :  { %844 = vmatprep.subr.bf16.mxu0 %v925_v52 }
  0x5c   :  { %845 = vmatpush3.bf16.msra.mxu0 %v926_v56 }
  0x5d   :  { %846 = vmatprep.subr.bf16.mxu0 %v927_v58 }
  0x60   :  { %847 = vmatpush3.bf16.msra.mxu0 %v928_v61 }
  0x61   :  { %848 = vmatprep.subr.bf16.mxu0 %v930_v62 }
  0x64   :  { %849 = vmatpush3.bf16.msra.mxu0 %v931_v63 }
  0x67   :  { %589 = vmatmul.mubr.bf16.vlgmr.msra.gmra.mrb[4].mxu0 %v159_v1 }
  0xb9   :  { %v642_v30 = vpop.permute.xlu0 %641 }
 0x11a   :  { %v806_v4 = vpop.f32.mrb[0].mxu0 }
 0x11b   :  { %v807_v6 = vpop.f32.mrb[1].mxu0 }
 0x11c   :  { %v808_v7 = vadd.f32 %v807_v6, %v806_v4  ;;  %v809_v8 = vpop.f32.mrb[2].mxu0  ;;  %v828_v9 = vpop.f32.mrb[0].mxu1 }
 0x11d   :  { %v810_v10 = vpop.f32.mrb[3].mxu0  ;;  %v829_v12 = vpop.f32.mrb[1].mxu1 }
 0x11e   :  { %v511_v11 = vadd.f32 %v808_v7, %v738_v5  ;;  %v830_v13 = vadd.f32 %v829_v12, %v828_v9  ;;  %v831_v14 = vpop.f32.mrb[2].mxu1 }
 0x11f   :  { %v832_v15 = vpop.f32.mrb[3].mxu1 }
 0x120   :  { %v551_v16 = vadd.f32 %v830_v13, %v511_v11 }
 0x124   :  { %v630_v17 = vpop.f32.mrb[4].mxu1 }
 0x125   :  { %v867_v18 = vpop.f32.mrb[5].mxu1 }
 0x126   :  { %v633_v19 = vpop.f32.mrb[6].mxu1 }
 0x127   :  { %v868_v20 = vpop.f32.mrb[7].mxu1 }
 0x13a   :  { %v850_v21 = vpop.f32.mrb[4].mxu0 }
 0x13b   :  { %v851_v22 = vpop.f32.mrb[5].mxu0 }
 0x13c   :  { %v852_v23 = vadd.f32 %v851_v22, %v850_v21  ;;  %v853_v24 = vpop.f32.mrb[6].mxu0 }
 0x13d   :  { %v854_v25 = vpop.f32.mrb[7].mxu0 }
 0x13e   :  { %v591_v26 = vadd.f32 %v852_v23, %v551_v16 }
 0x140   :  { %v631_v27 = vadd.f32 %v630_v17, %v591_v26 }
 0x142   :  { %v636_v28 = vmax.f32 %v631_v27, 0.0 }
 0x144   :  { %870 = vmatpush3.xpose.msra.mxu1 %v636_v28 }
 0x147   :  { %872 = vmatmul.mubr.f32.vlgmr.msra.gmra.mrb[8].mxu1 %v637_v29 }
 0x21a   :  { %v710_v31 = vpop.f32.mrb[8].mxu1 }
 0x21b   :  { %v711_v32 = vadd.f32 %v710_v31, %v642_v30  ;;  %v873_v33 = vpop.f32.mrb[9].mxu1 }
 0x21d   :  { %v714_v34 = vsub.f32 0.0, %v711_v32 }
 0x21f   :  { %v715_v35 = vmul.f32 1.442695, %v714_v34 }
 0x221   :  { %933 = vpow2.f32 %v715_v35 }
 0x22b   :  { %v934_v36 = vpop.eup %933 }
 0x22c   :  { %v717_v37 = vadd.f32 1.0, %v934_v36 }
 0x22e   :  { %935 = vrcp.f32 %v717_v37 }
 0x238   :  { %v936_v38 = vpop.eup %935 }
 0x239   :  { %721 = vst.msk [vmem:[#allocation7] sm:$0x3] %vm720_vm3, %v936_v38 }
 0x23a   :  { %992 = shalt.err (!%p989_p6)
}
 0x23b   :  { %s993_s25 = scalar_lea.hbm %s1106_s5, 32 }
 0x23c   :  { %p994_p7 = scmp.ne.s32.totalorder %s1106_s5, %s993_s25  ;;  %p997_p8 = scmp.lt.u32.totalorder %s993_s25, %s1106_s5 }
 0x23e   :  { %p999_p9 = pnand %p997_p8, %p994_p7 }
 0x240   :  { %1002 = shalt.err (!%p999_p9)
}
 0x241   :  { %731 = dma.vmem_to_hbm [thread:$0]  %s729_s22, 32, %s1106_s5, [#allocation4]  }
 0x242   :  { %1007 = dma.done.wait [#allocation4], 32  }
 0x243   :  { %1008 = vsyncadd [#allocation4], 4294967264 }
 0x244   :  { %735 = vsyncpa [#allocation3], 1 }
 0x245   :  { %736 = vsyncpa [#allocation6], 1 }
 0x246   :  { %737 = vsyncpa [#allocation4], 1 }

</bundles_post_ra>
